<compile_context>
chip_gen: v7x
topology: tpu7x:2x2x1
jax: 0.10.0
libtpu: 0.0.40
codegen_flags: <defaults>
</compile_context>

<pallas_src>
import jax
import jax.numpy as jnp
from jax.experimental import pallas as pl
from jax.experimental.pallas import tpu as pltpu

# Largest batch tile (lanes, f32).  Per step: 2 * 8 * TB * 4 B of VMEM per
# array with double buffering -> ~8 MiB total; per-step HBM bytes (~2 MiB)
# comfortably amortize the ~0.35 us grid-step overhead on every generation.
_TB_MAX = 65536


def make_params(weight, bias):
    """One-time packing of nn.Linear params into a (Fout, Fin+1) [W | b] slab.

    weight: (Fout, Fin) in PyTorch (out_features, in_features) layout.
    bias:   (Fout,)
    """
    fout = weight.shape[0]
    return jnp.concatenate(
        [weight.astype(jnp.float32), bias.reshape(fout, 1).astype(jnp.float32)],
        axis=1,
    )


def linear_t_kernel(params_ref, xt_ref, ot_ref):
    # params_ref: (Fout, Fin+1) in SMEM  -- [W | b], W in (out, in) layout
    # xt_ref:     (Fin, TB)     in VMEM  -- activations, batch on the lane axis
    # ot_ref:     (Fout, TB)    in VMEM  -- y^T tile
    fin = xt_ref.shape[0]
    fout = ot_ref.shape[0]

    xt = xt_ref[...]  # (Fin, TB) -- single VMEM load, reused for all rows

    # y^T[j, :] = sum_k W[j, k] * x^T[k, :] + b[j]
    # Scalar weights come from SMEM (sreg path, free operand of the VPU FMA);
    # no lane broadcasts, no MXU (4x4xB would be <0.1% MXU utilization).
    for j in range(fout):                       # static, unrolled at trace time
        row = xt[0:1, :] * params_ref[j, 0] + params_ref[j, fin]
        for k in range(1, fin):                 # static, unrolled at trace time
            row = row + xt[k:k + 1, :] * params_ref[j, k]
        ot_ref[j:j + 1, :] = row.astype(ot_ref.dtype)


@jax.jit
def iris_forward_t(params, xt):
    """Kernel-native forward: y^T = W @ x^T + b.

    params: (Fout, Fin+1) = [W | b]   (built once by make_params)
    xt:     (Fin, B)  float32, batch on the lane axis
    returns (Fout, B) float32
    """
    fin, B = xt.shape
    fout = params.shape[0]

    # Tile the batch (lane) axis.  For small / non-128-multiple B use a single
    # full-extent block (allowed by the BlockSpec rules); otherwise a
    # 128-multiple tile so partial last blocks stay legal.
    tb = B if (B <= _TB_MAX or B % 128 != 0) else _TB_MAX
    grid = (pl.cdiv(B, tb),)

    return pl.pallas_call(
        linear_t_kernel,
        out_shape=jax.ShapeDtypeStruct((fout, B), xt.dtype),
        grid=grid,
        in_specs=[
            # Whole param slab in SMEM (4x5 f32 -> one 4 KiB padded tile).
            pl.BlockSpec(memory_space=pltpu.MemorySpace.SMEM),
            # Batch-tiled activations in VMEM, auto double-buffered.
            pl.BlockSpec((fin, tb), lambda i: (0, i)),
        ],
        out_specs=pl.BlockSpec((fout, tb), lambda i: (0, i)),
        compiler_params=pltpu.CompilerParams(
            # Batch tiles are independent -> megacore sharding on v7x.
            dimension_semantics=("parallel",),
        ),
    )(params, xt)


if __name__ == "__main__":
    key = jax.random.PRNGKey(0)
    kx, kw, kb = jax.random.split(key, 3)

    B, fin, fout = 8, 4, 4

    # PyTorch-style tensors (mimic nn.Linear init range U(-0.5, 0.5)).
    x = jax.random.normal(kx, (B, fin), dtype=jnp.float32)
    weight = jax.random.uniform(kw, (fout, fin), dtype=jnp.float32,
                                minval=-0.5, maxval=0.5)
    bias = jax.random.uniform(kb, (fout,), dtype=jnp.float32,
                              minval=-0.5, maxval=0.5)

    # One-time setup: pack params; choose the kernel-native (Fin, B) layout.
    # (In a real model the surrounding code keeps this layout end-to-end; the
    # transpose here exists only to build the example from PyTorch-layout x.)
    params = make_params(weight, bias)
    xt = jnp.asarray(x.T)                                   # (Fin, B)

    yt = iris_forward_t(params, xt)                         # (Fout, B)
    yt = jax.block_until_ready(yt)

    # Reference check against plain JAX (same math as torch.nn.Linear).
    y_ref = x @ weight.T + bias
    assert yt.shape == (fout, B)
    assert jnp.allclose(yt.T, y_ref, atol=1e-5, rtol=1e-5)

    print("KERNEL_OK")
</pallas_src>

<mosaic_0001>
module attributes {stable_mosaic.version = 11 : i64} {
  func.func @linear_t_kernel(%arg0: i32, %arg1: memref<4x5xf32, #tpu.memory_space<smem>>, %arg2: memref<4x8xf32, #tpu.memory_space<vmem>>, %arg3: memref<4x8xf32, #tpu.memory_space<vmem>>) attributes {dimension_semantics = [#tpu.dimension_semantics<parallel>], iteration_bounds = array<i64: 1>, scalar_prefetch = 0 : i64, scratch_operands = 0 : i64, tpu.core_type = #tpu.core_type<tc>, window_params = [{transform_indices = @transform_0, window_bounds = array<i64: 4, 5>}, {transform_indices = @transform_1, window_bounds = array<i64: 4, 8>}, {transform_indices = @transform_2, window_bounds = array<i64: 4, 8>}]} {
    %c0 = arith.constant 0 : index
    %c0_0 = arith.constant 0 : index
    %0 = vector.load %arg2[%c0, %c0_0] : memref<4x8xf32, #tpu.memory_space<vmem>>, vector<4x8xf32>
    %1 = vector.extract_strided_slice %0 {offsets = [0, 0], sizes = [1, 8], strides = [1, 1]} : vector<4x8xf32> to vector<1x8xf32>
    %c0_1 = arith.constant 0 : index
    %c0_2 = arith.constant 0 : index
    %2 = memref.load %arg1[%c0_1, %c0_2] : memref<4x5xf32, #tpu.memory_space<smem>>
    %3 = vector.broadcast %2 : f32 to vector<1x8xf32>
    %4 = arith.mulf %1, %3 : vector<1x8xf32>
    %c0_3 = arith.constant 0 : index
    %c4 = arith.constant 4 : index
    %5 = memref.load %arg1[%c0_3, %c4] : memref<4x5xf32, #tpu.memory_space<smem>>
    %6 = vector.broadcast %5 : f32 to vector<1x8xf32>
    %7 = arith.addf %4, %6 : vector<1x8xf32>
    %8 = vector.extract_strided_slice %0 {offsets = [1, 0], sizes = [1, 8], strides = [1, 1]} : vector<4x8xf32> to vector<1x8xf32>
    %c0_4 = arith.constant 0 : index
    %c1 = arith.constant 1 : index
    %9 = memref.load %arg1[%c0_4, %c1] : memref<4x5xf32, #tpu.memory_space<smem>>
    %10 = vector.broadcast %9 : f32 to vector<1x8xf32>
    %11 = arith.mulf %8, %10 : vector<1x8xf32>
    %12 = arith.addf %7, %11 : vector<1x8xf32>
    %13 = vector.extract_strided_slice %0 {offsets = [2, 0], sizes = [1, 8], strides = [1, 1]} : vector<4x8xf32> to vector<1x8xf32>
    %c0_5 = arith.constant 0 : index
    %c2 = arith.constant 2 : index
    %14 = memref.load %arg1[%c0_5, %c2] : memref<4x5xf32, #tpu.memory_space<smem>>
    %15 = vector.broadcast %14 : f32 to vector<1x8xf32>
    %16 = arith.mulf %13, %15 : vector<1x8xf32>
    %17 = arith.addf %12, %16 : vector<1x8xf32>
    %18 = vector.extract_strided_slice %0 {offsets = [3, 0], sizes = [1, 8], strides = [1, 1]} : vector<4x8xf32> to vector<1x8xf32>
    %c0_6 = arith.constant 0 : index
    %c3 = arith.constant 3 : index
    %19 = memref.load %arg1[%c0_6, %c3] : memref<4x5xf32, #tpu.memory_space<smem>>
    %20 = vector.broadcast %19 : f32 to vector<1x8xf32>
    %21 = arith.mulf %18, %20 : vector<1x8xf32>
    %22 = arith.addf %17, %21 : vector<1x8xf32>
    %c0_7 = arith.constant 0 : index
    %c0_8 = arith.constant 0 : index
    %23 = vector.load %arg3[%c0_7, %c0_8] : memref<4x8xf32, #tpu.memory_space<vmem>>, vector<1x8xf32>
    tpu.vector_store %arg3[%c0_7, %c0_8], %22 {strides = array<i32>} : memref<4x8xf32, #tpu.memory_space<vmem>>, vector<1x8xf32>,
    %24 = vector.extract_strided_slice %0 {offsets = [0, 0], sizes = [1, 8], strides = [1, 1]} : vector<4x8xf32> to vector<1x8xf32>
    %c1_9 = arith.constant 1 : index
    %c0_10 = arith.constant 0 : index
    %25 = memref.load %arg1[%c1_9, %c0_10] : memref<4x5xf32, #tpu.memory_space<smem>>
    %26 = vector.broadcast %25 : f32 to vector<1x8xf32>
    %27 = arith.mulf %24, %26 : vector<1x8xf32>
    %c1_11 = arith.constant 1 : index
    %c4_12 = arith.constant 4 : index
    %28 = memref.load %arg1[%c1_11, %c4_12] : memref<4x5xf32, #tpu.memory_space<smem>>
    %29 = vector.broadcast %28 : f32 to vector<1x8xf32>
    %30 = arith.addf %27, %29 : vector<1x8xf32>
    %31 = vector.extract_strided_slice %0 {offsets = [1, 0], sizes = [1, 8], strides = [1, 1]} : vector<4x8xf32> to vector<1x8xf32>
    %c1_13 = arith.constant 1 : index
    %c1_14 = arith.constant 1 : index
    %32 = memref.load %arg1[%c1_13, %c1_14] : memref<4x5xf32, #tpu.memory_space<smem>>
    %33 = vector.broadcast %32 : f32 to vector<1x8xf32>
    %34 = arith.mulf %31, %33 : vector<1x8xf32>
    %35 = arith.addf %30, %34 : vector<1x8xf32>
    %36 = vector.extract_strided_slice %0 {offsets = [2, 0], sizes = [1, 8], strides = [1, 1]} : vector<4x8xf32> to vector<1x8xf32>
    %c1_15 = arith.constant 1 : index
    %c2_16 = arith.constant 2 : index
    %37 = memref.load %arg1[%c1_15, %c2_16] : memref<4x5xf32, #tpu.memory_space<smem>>
    %38 = vector.broadcast %37 : f32 to vector<1x8xf32>
    %39 = arith.mulf %36, %38 : vector<1x8xf32>
    %40 = arith.addf %35, %39 : vector<1x8xf32>
    %41 = vector.extract_strided_slice %0 {offsets = [3, 0], sizes = [1, 8], strides = [1, 1]} : vector<4x8xf32> to vector<1x8xf32>
    %c1_17 = arith.constant 1 : index
    %c3_18 = arith.constant 3 : index
    %42 = memref.load %arg1[%c1_17, %c3_18] : memref<4x5xf32, #tpu.memory_space<smem>>
    %43 = vector.broadcast %42 : f32 to vector<1x8xf32>
    %44 = arith.mulf %41, %43 : vector<1x8xf32>
    %45 = arith.addf %40, %44 : vector<1x8xf32>
    %c1_19 = arith.constant 1 : index
    %c0_20 = arith.constant 0 : index
    %46 = vector.load %arg3[%c1_19, %c0_20] : memref<4x8xf32, #tpu.memory_space<vmem>>, vector<1x8xf32>
    tpu.vector_store %arg3[%c1_19, %c0_20], %45 {strides = array<i32>} : memref<4x8xf32, #tpu.memory_space<vmem>>, vector<1x8xf32>,
    %47 = vector.extract_strided_slice %0 {offsets = [0, 0], sizes = [1, 8], strides = [1, 1]} : vector<4x8xf32> to vector<1x8xf32>
    %c2_21 = arith.constant 2 : index
    %c0_22 = arith.constant 0 : index
    %48 = memref.load %arg1[%c2_21, %c0_22] : memref<4x5xf32, #tpu.memory_space<smem>>
    %49 = vector.broadcast %48 : f32 to vector<1x8xf32>
    %50 = arith.mulf %47, %49 : vector<1x8xf32>
    %c2_23 = arith.constant 2 : index
    %c4_24 = arith.constant 4 : index
    %51 = memref.load %arg1[%c2_23, %c4_24] : memref<4x5xf32, #tpu.memory_space<smem>>
    %52 = vector.broadcast %51 : f32 to vector<1x8xf32>
    %53 = arith.addf %50, %52 : vector<1x8xf32>
    %54 = vector.extract_strided_slice %0 {offsets = [1, 0], sizes = [1, 8], strides = [1, 1]} : vector<4x8xf32> to vector<1x8xf32>
    %c2_25 = arith.constant 2 : index
    %c1_26 = arith.constant 1 : index
    %55 = memref.load %arg1[%c2_25, %c1_26] : memref<4x5xf32, #tpu.memory_space<smem>>
    %56 = vector.broadcast %55 : f32 to vector<1x8xf32>
    %57 = arith.mulf %54, %56 : vector<1x8xf32>
    %58 = arith.addf %53, %57 : vector<1x8xf32>
    %59 = vector.extract_strided_slice %0 {offsets = [2, 0], sizes = [1, 8], strides = [1, 1]} : vector<4x8xf32> to vector<1x8xf32>
    %c2_27 = arith.constant 2 : index
    %c2_28 = arith.constant 2 : index
    %60 = memref.load %arg1[%c2_27, %c2_28] : memref<4x5xf32, #tpu.memory_space<smem>>
    %61 = vector.broadcast %60 : f32 to vector<1x8xf32>
    %62 = arith.mulf %59, %61 : vector<1x8xf32>
    %63 = arith.addf %58, %62 : vector<1x8xf32>
    %64 = vector.extract_strided_slice %0 {offsets = [3, 0], sizes = [1, 8], strides = [1, 1]} : vector<4x8xf32> to vector<1x8xf32>
    %c2_29 = arith.constant 2 : index
    %c3_30 = arith.constant 3 : index
    %65 = memref.load %arg1[%c2_29, %c3_30] : memref<4x5xf32, #tpu.memory_space<smem>>
    %66 = vector.broadcast %65 : f32 to vector<1x8xf32>
    %67 = arith.mulf %64, %66 : vector<1x8xf32>
    %68 = arith.addf %63, %67 : vector<1x8xf32>
    %c2_31 = arith.constant 2 : index
    %c0_32 = arith.constant 0 : index
    %69 = vector.load %arg3[%c2_31, %c0_32] : memref<4x8xf32, #tpu.memory_space<vmem>>, vector<1x8xf32>
    tpu.vector_store %arg3[%c2_31, %c0_32], %68 {strides = array<i32>} : memref<4x8xf32, #tpu.memory_space<vmem>>, vector<1x8xf32>,
    %70 = vector.extract_strided_slice %0 {offsets = [0, 0], sizes = [1, 8], strides = [1, 1]} : vector<4x8xf32> to vector<1x8xf32>
    %c3_33 = arith.constant 3 : index
    %c0_34 = arith.constant 0 : index
    %71 = memref.load %arg1[%c3_33, %c0_34] : memref<4x5xf32, #tpu.memory_space<smem>>
    %72 = vector.broadcast %71 : f32 to vector<1x8xf32>
    %73 = arith.mulf %70, %72 : vector<1x8xf32>
    %c3_35 = arith.constant 3 : index
    %c4_36 = arith.constant 4 : index
    %74 = memref.load %arg1[%c3_35, %c4_36] : memref<4x5xf32, #tpu.memory_space<smem>>
    %75 = vector.broadcast %74 : f32 to vector<1x8xf32>
    %76 = arith.addf %73, %75 : vector<1x8xf32>
    %77 = vector.extract_strided_slice %0 {offsets = [1, 0], sizes = [1, 8], strides = [1, 1]} : vector<4x8xf32> to vector<1x8xf32>
    %c3_37 = arith.constant 3 : index
    %c1_38 = arith.constant 1 : index
    %78 = memref.load %arg1[%c3_37, %c1_38] : memref<4x5xf32, #tpu.memory_space<smem>>
    %79 = vector.broadcast %78 : f32 to vector<1x8xf32>
    %80 = arith.mulf %77, %79 : vector<1x8xf32>
    %81 = arith.addf %76, %80 : vector<1x8xf32>
    %82 = vector.extract_strided_slice %0 {offsets = [2, 0], sizes = [1, 8], strides = [1, 1]} : vector<4x8xf32> to vector<1x8xf32>
    %c3_39 = arith.constant 3 : index
    %c2_40 = arith.constant 2 : index
    %83 = memref.load %arg1[%c3_39, %c2_40] : memref<4x5xf32, #tpu.memory_space<smem>>
    %84 = vector.broadcast %83 : f32 to vector<1x8xf32>
    %85 = arith.mulf %82, %84 : vector<1x8xf32>
    %86 = arith.addf %81, %85 : vector<1x8xf32>
    %87 = vector.extract_strided_slice %0 {offsets = [3, 0], sizes = [1, 8], strides = [1, 1]} : vector<4x8xf32> to vector<1x8xf32>
    %c3_41 = arith.constant 3 : index
    %c3_42 = arith.constant 3 : index
    %88 = memref.load %arg1[%c3_41, %c3_42] : memref<4x5xf32, #tpu.memory_space<smem>>
    %89 = vector.broadcast %88 : f32 to vector<1x8xf32>
    %90 = arith.mulf %87, %89 : vector<1x8xf32>
    %91 = arith.addf %86, %90 : vector<1x8xf32>
    %c3_43 = arith.constant 3 : index
    %c0_44 = arith.constant 0 : index
    %92 = vector.load %arg3[%c3_43, %c0_44] : memref<4x8xf32, #tpu.memory_space<vmem>>, vector<1x8xf32>
    tpu.vector_store %arg3[%c3_43, %c0_44], %91 {strides = array<i32>} : memref<4x8xf32, #tpu.memory_space<vmem>>, vector<1x8xf32>,
    return
  }
  func.func @transform_0(%arg0: i32) -> (i32, i32) {
    %c0_i32 = arith.constant 0 : i32
    %c0_i32_0 = arith.constant 0 : i32
    %c0_i32_1 = arith.constant 0 : i32
    return %c0_i32, %c0_i32_0 : i32, i32
  }
  func.func @transform_1(%arg0: i32) -> (i32, i32) {
    %c0_i32 = arith.constant 0 : i32
    %c0_i32_0 = arith.constant 0 : i32
    return %c0_i32, %arg0 : i32, i32
  }
  func.func @transform_2(%arg0: i32) -> (i32, i32) {
    %c0_i32 = arith.constant 0 : i32
    %c0_i32_0 = arith.constant 0 : i32
    return %c0_i32, %arg0 : i32, i32
  }
}

</mosaic_0001>

<bundles_post_ra>
// kernel: iris_forward_t.1
= control target key start
LH: loop header
LB: loop body
LE: loop exit
PB: predicated region body
PF: predicated region fallthrough
CT: control target
= control target key end

     0   :  { %7 = vsyncpa [#allocation5], 0  ;;  %s365_s0 = inlined_call_operand.hbm [shape: f32[4,5], index: 0, kind: input, shape index: {}]   ;;  %s366_s1 = inlined_call_operand.hbm [shape: f32[4,8], index: 1, kind: input, shape index: {}]   ;;  %s367_s2 = inlined_call_operand.hbm [shape: f32[4,8], index: 2, kind: output, shape index: {}]  }
   0x1   :  { %8 = vsyncpa [#allocation3], 0 }
   0x2   :  { %9 = vsyncpa [#allocation4], 0  ;;  %s187_s11 = scalar_lea.hbm %s365_s0, 64 }
   0x3   :  { %p188_p0 = scmp.ne.s32.totalorder %s365_s0, %s187_s11  ;;  %p191_p1 = scmp.lt.u32.totalorder %s187_s11, %s365_s0 }
   0x5   :  { %p193_p2 = pnand %p191_p1, %p188_p0 }
   0x7   :  { %196 = shalt.err (!%p193_p2)
}
   0x8   :  { %s247_s16 = smov [#allocation2]   ;;  %s248_s19 = smov [#allocation6]  }
   0x9   :  { %17 = dma.hbm_to_smem %s365_s0, 64, %s247_s16, [#allocation5]  }
   0xa   :  { %s24_s20 = sshll.u32 %s248_s19, 4  ;;  %s197_s23 = scalar_lea.hbm %s366_s1, 64  ;;  %s25_s20 = int_to_ptr.vmem [resolvable:$true] %s24_s20 }
   0xb   :  { %p198_p3 = scmp.ne.s32.totalorder %s366_s1, %s197_s23  ;;  %p201_p4 = scmp.lt.u32.totalorder %s197_s23, %s366_s1 }
   0xd   :  { %p203_p5 = pnand %p201_p4, %p198_p3 }
   0xf   :  { %206 = shalt.err (!%p203_p5)
}
  0x10   :  { %s207_s28 = scalar_lea.vmem %s25_s20, 64  ;;  %p212_p7 = scmp.lt.s32.totalorder %s25_s20, %s25_s20 }
  0x11   :  { %p208_p6 = scmp.ne.s32.totalorder %s25_s20, %s207_s28  ;;  %p213_p8 = scmp.lt.s32.totalorder %s207_s28, %s207_s28 }
  0x13   :  { %p214_p9 = por %p213_p8, %p212_p7 }
  0x15   :  { %p215_p10 = pnand %p214_p9, %p208_p6 }
  0x17   :  { %218 = shalt.err (!%p215_p10)
}
  0x18   :  { %27 = dma.hbm_to_vmem [thread:$0]  %s366_s1, 64, %s25_s20, [#allocation3]  }
  0x19   :  { %241 = dma.done.wait [#allocation5], 64  }
  0x1a   :  { %242 = vsyncadd [#allocation5], 4294967232 }
  0x1b   :  { %243 = dma.done.wait [#allocation3], 64  }
  0x1c   :  { %244 = vsyncadd [#allocation3], 4294967232 }
  0x1d   :  { %34 = sfence }
  0x1e   :  { %s36_s30 = sld [smem:[#allocation2]]  ;;  %s165_s3 = sld [smem:[#allocation2 + $0x4]]  ;;  %v293_v0 = vld [vmem:[#allocation6] sm:$0xf]  ;;  %vm63_vm0 = vcmask 57344  }
  0x1f   :  { %s166_s4 = sld [smem:[#allocation2 + $0x1]]  ;;  %s167_s5 = sld [smem:[#allocation2 + $0x2]] }
  0x20   :  { %s168_s6 = sld [smem:[#allocation2 + $0x3]]  ;;  %s169_s7 = sld [smem:[#allocation2 + $0x80]] }
  0x21   :  { %s289_s8 = sld [smem:[#allocation2 + $0x84]]  ;;  %s291_s9 = sld [smem:[#allocation2 + $0x81]] }
  0x22   :  { %s295_s10 = sld [smem:[#allocation2 + $0x82]]  ;;  %s297_s1 = sld [smem:[#allocation2 + $0x83]] }
  0x23   :  { %s299_s11 = sld [smem:[#allocation2 + $0x100]]  ;;  %s301_s12 = sld [smem:[#allocation2 + $0x104]] }
  0x24   :  { %v37_v1 = vstv %s36_s30  ;;  %v40_v2 = vstv %s165_s3  ;;  %s303_s13 = sld [smem:[#allocation2 + $0x101]]  ;;  %s305_s14 = sld [smem:[#allocation2 + $0x102]] }
  0x25   :  { %v38_v3 = vmul.f32 %v37_v1, %v293_v0  ;;  %v43_v4 = vstv %s166_s4  ;;  %v50_v5 = vstv %s167_s5  ;;  %s308_s15 = sld [smem:[#allocation2 + $0x103]]  ;;  %s312_s16 = sld [smem:[#allocation2 + $0x180]] }
  0x26   :  { %v44_v6 = vmul.f32 %v43_v4, %v293_v0  ;;  %v51_v7 = vmul.f32 %v50_v5, %v293_v0  ;;  %v57_v8 = vstv %s168_s6  ;;  %v66_v9 = vstv %s169_s7  ;;  %s317_s17 = sld [smem:[#allocation2 + $0x184]]  ;;  %s321_s18 = sld [smem:[#allocation2 + $0x181]] }
  0x27   :  { %v41_v10 = vadd.f32 %v40_v2, %v38_v3  ;;  %v58_v11 = vmul.f32 %v57_v8, %v293_v0  ;;  %v67_v12 = vmul.f32 %v66_v9, %v293_v0  ;;  %v69_v13 = vstv %s289_s8  ;;  %s323_s19 = sld [smem:[#allocation2 + $0x182]]  ;;  %s330_s20 = sld [smem:[#allocation2 + $0x183]] }
  0x28   :  { %v46_v14 = vrot.slane %v44_v6, 1  ;;  %v53_v15 = vrot.slane %v51_v7, 2  ;;  %v72_v16 = vstv %s291_s9  ;;  %v79_v17 = vstv %s295_s10  ;;  %s249_s21 = smov [#allocation7]  }
  0x29   :  { %v60_v18 = vrot.slane %v58_v11, 3  ;;  %v70_v19 = vadd.f32 %v69_v13, %v67_v12  ;;  %v73_v20 = vmul.f32 %v72_v16, %v293_v0  ;;  %v80_v21 = vmul.f32 %v79_v17, %v293_v0  ;;  %s155_s22 = sshll.u32 %s249_s21, 4  ;;  %s156_s22 = int_to_ptr.vmem [resolvable:$true] %s155_s22 }
  0x2a   :  { %v48_v22 = vadd.f32 %v46_v14, %v41_v10  ;;  %v86_v23 = vstv %s297_s1  ;;  %v94_v24 = vstv %s299_s11  ;;  %v97_v25 = vstv %s301_s12  ;;  %s219_s23 = scalar_lea.vmem %s156_s22, 64  ;;  %p224_p12 = scmp.lt.s32.totalorder %s156_s22, %s156_s22 }
  0x2b   :  { %v75_v26 = vrot.slane %v73_v20, 1  ;;  %v82_v27 = vrot.slane %v80_v21, 2  ;;  %v87_v28 = vmul.f32 %v86_v23, %v293_v0  ;;  %v95_v29 = vmul.f32 %v94_v24, %v293_v0  ;;  %p220_p11 = scmp.ne.s32.totalorder %s156_s22, %s219_s23  ;;  %p225_p13 = scmp.lt.s32.totalorder %s219_s23, %s219_s23 }
  0x2c   :  { %v55_v30 = vadd.f32 %v53_v15, %v48_v22  ;;  %v100_v31 = vstv %s303_s13  ;;  %v107_v32 = vstv %s305_s14  ;;  %v114_v33 = vstv %s308_s15 }
  0x2d   :  { %v77_v34 = vadd.f32 %v75_v26, %v70_v19  ;;  %v89_v35 = vrot.slane %v87_v28, 3  ;;  %v98_v36 = vadd.f32 %v97_v25, %v95_v29  ;;  %v101_v37 = vmul.f32 %v100_v31, %v293_v0  ;;  %p226_p0 = por %p225_p13, %p224_p12 }
  0x2e   :  { %v62_v38 = vadd.f32 %v60_v18, %v55_v30  ;;  %v108_v39 = vmul.f32 %v107_v32, %v293_v0  ;;  %v115_v40 = vmul.f32 %v114_v33, %v293_v0  ;;  %v122_v41 = vstv %s312_s16 }
  0x2f   :  { %v84_v42 = vadd.f32 %v82_v27, %v77_v34  ;;  %v103_v43 = vrot.slane %v101_v37, 1  ;;  %v123_v44 = vmul.f32 %v122_v41, %v293_v0  ;;  %v125_v45 = vstv %s317_s17  ;;  %p227_p1 = pnand %p226_p0, %p220_p11 }
  0x30   :  { %64 = vst.msk [vmem:[#allocation7] sm:$0x1] %vm63_vm0, %v62_v38  ;;  %v110_v46 = vrot.slane %v108_v39, 2  ;;  %v117_v47 = vrot.slane %v115_v40, 3  ;;  %v128_v48 = vstv %s321_s18  ;;  %v135_v49 = vstv %s323_s19 }
  0x31   :  { %v91_v50 = vadd.f32 %v89_v35, %v84_v42  ;;  %v105_v51 = vadd.f32 %v103_v43, %v98_v36  ;;  %v126_v52 = vadd.f32 %v125_v45, %v123_v44  ;;  %v129_v53 = vmul.f32 %v128_v48, %v293_v0 }
  0x32   :  { %v136_v54 = vmul.f32 %v135_v49, %v293_v0  ;;  %v142_v55 = vstv %s330_s20 }
  0x33   :  { %92 = vst.msk [vmem:[#allocation7 + $0x1] sm:$0x1] %vm63_vm0, %v91_v50  ;;  %v112_v56 = vadd.f32 %v110_v46, %v105_v51  ;;  %v131_v57 = vrot.slane %v129_v53, 1  ;;  %v143_v58 = vmul.f32 %v142_v55, %v293_v0 }
  0x34   :  { %v138_v59 = vrot.slane %v136_v54, 2 }
  0x35   :  { %v119_v60 = vadd.f32 %v117_v47, %v112_v56  ;;  %v133_v61 = vadd.f32 %v131_v57, %v126_v52  ;;  %v145_v62 = vrot.slane %v143_v58, 3 }
  0x37   :  { %120 = vst.msk [vmem:[#allocation7 + $0x2] sm:$0x1] %vm63_vm0, %v119_v60  ;;  %v140_v63 = vadd.f32 %v138_v59, %v133_v61 }
  0x39   :  { %v147_v1 = vadd.f32 %v145_v62, %v140_v63 }
  0x3b   :  { %148 = vst.msk [vmem:[#allocation7 + $0x3] sm:$0x1] %vm63_vm0, %v147_v1 }
  0x3c   :  { %230 = shalt.err (!%p227_p1)
}
  0x3d   :  { %s231_s26 = scalar_lea.hbm %s367_s2, 64 }
  0x3e   :  { %p232_p2 = scmp.ne.s32.totalorder %s367_s2, %s231_s26  ;;  %p235_p3 = scmp.lt.u32.totalorder %s231_s26, %s367_s2 }
  0x40   :  { %p237_p4 = pnand %p235_p3, %p232_p2 }
  0x42   :  { %240 = shalt.err (!%p237_p4)
}
  0x43   :  { %158 = dma.vmem_to_hbm [thread:$0]  %s156_s22, 64, %s367_s2, [#allocation4]  }
  0x44   :  { %245 = dma.done.wait [#allocation4], 64  }
  0x45   :  { %246 = vsyncadd [#allocation4], 4294967232 }
  0x46   :  { %162 = vsyncpa [#allocation3], 1 }
  0x47   :  { %163 = vsyncpa [#allocation4], 1 }
  0x48   :  { %164 = vsyncpa [#allocation5], 1 }

</bundles_post_ra>
